<compile_context>
chip_gen: v5e
topology: v5e:2x2
jax: 0.10.0
libtpu: 0.0.40
codegen_flags: <defaults>
</compile_context>

<pallas_src>
import functools

import jax
import jax.numpy as jnp
from jax.experimental import pallas as pl
from jax.experimental.pallas import tpu as pltpu


def _round_up(x, m):
    return ((x + m - 1) // m) * m


_SUPPORTED_ACTIVATIONS = (None, "sigmoid", "relu", "hardtanh")


def _nonlinear_kernel(*refs, activation_name, has_bias):
    """One (tm, tn) output tile, accumulated over the K grid axis.

    refs = (x_ref, w_ref, [b_ref], o_ref, acc_ref)
    """
    if has_bias:
        x_ref, w_ref, b_ref, o_ref, acc_ref = refs
    else:
        x_ref, w_ref, o_ref, acc_ref = refs
        b_ref = None

    k = pl.program_id(2)

    @pl.when(k == 0)
    def _():
        acc_ref[...] = jnp.zeros_like(acc_ref)

    acc_ref[...] += jnp.dot(
        x_ref[...], w_ref[...], preferred_element_type=jnp.float32
    )

    @pl.when(k == pl.num_programs(2) - 1)
    def _():
        h = acc_ref[...]
        if has_bias:
            h = h + b_ref[...].astype(jnp.float32)  # broadcast (1, tn) over rows
        if activation_name == "sigmoid":
            h = jax.nn.sigmoid(h)
        elif activation_name == "relu":
            h = jnp.maximum(h, 0.0)
        elif activation_name == "hardtanh":
            h = jnp.clip(h, -1.0, 1.0)
        o_ref[...] = h.astype(o_ref.dtype)


def nonlinear(x, weight, bias=None, activation_name=None,
              tm=256, tn=256, tk=512, use_bf16_inputs=False):
    """Pallas equivalent of NonLinear.forward.

    x:      (B, input_size)
    weight: (input_size, output_size)   [transpose of torch Linear weight]
    bias:   (output_size,) or None
    """
    if activation_name not in _SUPPORTED_ACTIVATIONS:
        raise ValueError(f"unsupported activation: {activation_name}")

    B, in_dim = x.shape
    in_dim_w, out_dim = weight.shape
    assert in_dim == in_dim_w

    # Clamp nominal tiles for small problems while keeping (8, 128) alignment.
    tm = min(tm, _round_up(B, 8))
    tk = min(tk, _round_up(in_dim, 128))
    tn = min(tn, _round_up(out_dim, 128))

    Mp = _round_up(B, tm)
    Kp = _round_up(in_dim, tk)
    Np = _round_up(out_dim, tn)

    out_dtype = x.dtype
    x_p = x
    w_p = weight
    if use_bf16_inputs:
        x_p = x_p.astype(jnp.bfloat16)
        w_p = w_p.astype(jnp.bfloat16)
    # Zero padding along K is exact for the matmul; padded M/N rows/cols are
    # sliced off below.
    if (Mp, Kp) != (B, in_dim):
        x_p = jnp.pad(x_p, ((0, Mp - B), (0, Kp - in_dim)))
    if (Kp, Np) != (in_dim, out_dim):
        w_p = jnp.pad(w_p, ((0, Kp - in_dim), (0, Np - out_dim)))

    has_bias = bias is not None
    args = [x_p, w_p]
    in_specs = [
        pl.BlockSpec((tm, tk), lambda j, i, k: (i, k)),
        pl.BlockSpec((tk, tn), lambda j, i, k: (k, j)),
    ]
    if has_bias:
        b_p = bias
        if Np != out_dim:
            b_p = jnp.pad(b_p, (0, Np - out_dim))
        args.append(b_p.reshape(1, Np))
        in_specs.append(pl.BlockSpec((1, tn), lambda j, i, k: (0, j)))

    # j outermost, i next, k innermost: weight tile stays resident across i
    # steps when K fits in one tile; k is the reduction (accumulator) axis.
    grid = (Np // tn, Mp // tm, Kp // tk)

    in_itemsize = jnp.dtype(x_p.dtype).itemsize
    out_itemsize = jnp.dtype(out_dtype).itemsize
    vmem_est = (2 * (tm * tk + tk * tn + tn) * in_itemsize   # double-buffered inputs
                + 2 * tm * tn * out_itemsize                 # double-buffered output
                + tm * tn * 4)                               # f32 accumulator
    vmem_limit = int(min(max(2 * vmem_est, 16 * 1024 * 1024), 48 * 1024 * 1024))

    kernel = functools.partial(
        _nonlinear_kernel, activation_name=activation_name, has_bias=has_bias
    )

    out_p = pl.pallas_call(
        kernel,
        out_shape=jax.ShapeDtypeStruct((Mp, Np), out_dtype),
        grid_spec=pltpu.PrefetchScalarGridSpec(
            num_scalar_prefetch=0,
            grid=grid,
            in_specs=in_specs,
            out_specs=pl.BlockSpec((tm, tn), lambda j, i, k: (i, j)),
            scratch_shapes=[pltpu.VMEM((tm, tn), jnp.float32)],
        ),
        compiler_params=pltpu.CompilerParams(
            dimension_semantics=("parallel", "parallel", "arbitrary"),
            vmem_limit_bytes=vmem_limit,
        ),
    )(*args)

    if (Mp, Np) != (B, out_dim):
        out_p = out_p[:B, :out_dim]
    return out_p


def init_nonlinear_params(key, input_size, output_size, dtype=jnp.float32):
    """Deterministic, torch-nn.Linear-like init (uniform in +-1/sqrt(in))."""
    kw, kb = jax.random.split(key)
    bound = 1.0 / (input_size ** 0.5)
    # Stored as (in, out): transpose of torch's (out, in) weight.
    weight = jax.random.uniform(kw, (input_size, output_size), dtype,
                                minval=-bound, maxval=bound)
    bias = jax.random.uniform(kb, (output_size,), dtype,
                              minval=-bound, maxval=bound)
    return weight, bias


def reference_nonlinear(x, weight, bias, activation_name):
    h = jnp.dot(x, weight, precision=jax.lax.Precision.HIGHEST)
    if bias is not None:
        h = h + bias
    if activation_name == "sigmoid":
        h = jax.nn.sigmoid(h)
    elif activation_name == "relu":
        h = jnp.maximum(h, 0.0)
    elif activation_name == "hardtanh":
        h = jnp.clip(h, -1.0, 1.0)
    return h


if __name__ == "__main__":
    key = jax.random.PRNGKey(0)
    k_x, k_p, k_x2, k_p2 = jax.random.split(key, 4)

    # --- Small demo matching the module's typical use (Linear + Sigmoid) ---
    batch = 8
    input_size = 32
    output_size = 64

    x = jax.random.normal(k_x, (batch, input_size), jnp.float32)
    weight, bias = init_nonlinear_params(k_p, input_size, output_size)

    # NonLinear(input_size, output_size, bias=True, activation=nn.Sigmoid())
    out = jax.block_until_ready(nonlinear(x, weight, bias, activation_name="sigmoid"))
    ref = reference_nonlinear(x, weight, bias, "sigmoid")
    assert out.shape == (batch, output_size)
    assert jnp.allclose(out, ref, atol=1e-5, rtol=1e-5)

    # Pure linear (activation=None) and no-bias paths.
    out_lin = jax.block_until_ready(nonlinear(x, weight, bias, activation_name=None))
    assert jnp.allclose(out_lin, reference_nonlinear(x, weight, bias, None),
                        atol=1e-5, rtol=1e-5)
    out_nb = jax.block_until_ready(nonlinear(x, weight, None, activation_name="relu"))
    assert jnp.allclose(out_nb, reference_nonlinear(x, weight, None, "relu"),
                        atol=1e-5, rtol=1e-5)

    # --- Non-multiple shapes exercising padding + multi-tile grid (incl. K>1) ---
    b2, in2, out2 = 16, 600, 300
    x2 = jax.random.normal(k_x2, (b2, in2), jnp.float32)
    w2, bb2 = init_nonlinear_params(k_p2, in2, out2)
    out_big = jax.block_until_ready(nonlinear(x2, w2, bb2, activation_name="relu"))
    ref_big = reference_nonlinear(x2, w2, bb2, "relu")
    assert out_big.shape == (b2, out2)
    assert jnp.allclose(out_big, ref_big, atol=1e-3, rtol=1e-3)

    print("KERNEL_OK")
</pallas_src>

<mosaic_0001>
module attributes {stable_mosaic.version = 11 : i64} {
  func.func @_nonlinear_kernel(%arg0: i32, %arg1: i32, %arg2: i32, %arg3: memref<8x128xf32, #tpu.memory_space<vmem>>, %arg4: memref<128x128xf32, #tpu.memory_space<vmem>>, %arg5: memref<1x128xf32, #tpu.memory_space<vmem>>, %arg6: memref<8x128xf32, #tpu.memory_space<vmem>>, %arg7: memref<8x128xf32, #tpu.memory_space<vmem>>) attributes {dimension_semantics = [#tpu.dimension_semantics<parallel>, #tpu.dimension_semantics<parallel>, #tpu.dimension_semantics<arbitrary>], iteration_bounds = array<i64: 1, 1, 1>, scalar_prefetch = 0 : i64, scratch_operands = 1 : i64, tpu.core_type = #tpu.core_type<tc>, window_params = [{transform_indices = @transform_0, window_bounds = array<i64: 8, 128>}, {transform_indices = @transform_1, window_bounds = array<i64: 128, 128>}, {transform_indices = @transform_2, window_bounds = array<i64: 1, 128>}, {transform_indices = @transform_3, window_bounds = array<i64: 8, 128>}]} {
    %c0_i32 = arith.constant 0 : i32
    %0 = arith.cmpi eq, %arg2, %c0_i32 : i32
    %1 = arith.extui %0 : i1 to i32
    %c0_i32_0 = arith.constant 0 : i32
    %2 = arith.cmpi ne, %1, %c0_i32_0 : i32
    scf.if %2 {
      %cst_10 = arith.constant 0.000000e+00 : f32
      %12 = vector.broadcast %cst_10 : f32 to vector<8x128xf32>
      %c0_11 = arith.constant 0 : index
      %c0_12 = arith.constant 0 : index
      %13 = vector.load %arg7[%c0_11, %c0_12] : memref<8x128xf32, #tpu.memory_space<vmem>>, vector<8x128xf32>
      tpu.vector_store %arg7[%c0_11, %c0_12], %12 {strides = array<i32>} : memref<8x128xf32, #tpu.memory_space<vmem>>, vector<8x128xf32>,
    } else {
    }
    %c0 = arith.constant 0 : index
    %c0_1 = arith.constant 0 : index
    %3 = vector.load %arg7[%c0, %c0_1] : memref<8x128xf32, #tpu.memory_space<vmem>>, vector<8x128xf32>
    %c0_2 = arith.constant 0 : index
    %c0_3 = arith.constant 0 : index
    %4 = vector.load %arg3[%c0_2, %c0_3] : memref<8x128xf32, #tpu.memory_space<vmem>>, vector<8x128xf32>
    %c0_4 = arith.constant 0 : index
    %c0_5 = arith.constant 0 : index
    %5 = vector.load %arg4[%c0_4, %c0_5] : memref<128x128xf32, #tpu.memory_space<vmem>>, vector<128x128xf32>
    %cst = arith.constant dense<0.000000e+00> : vector<8x128xf32>
    %6 = tpu.matmul %4, %5, %cst {dimension_numbers = #tpu.dot_dimension_numbers<[1], [0], [0], [1], [0, 0, 1, 1], [], []>} : vector<8x128xf32>, vector<128x128xf32>, vector<8x128xf32> -> vector<8x128xf32>
    %7 = arith.addf %3, %6 : vector<8x128xf32>
    %c0_6 = arith.constant 0 : index
    %c0_7 = arith.constant 0 : index
    %8 = vector.load %arg7[%c0_6, %c0_7] : memref<8x128xf32, #tpu.memory_space<vmem>>, vector<8x128xf32>
    tpu.vector_store %arg7[%c0_6, %c0_7], %7 {strides = array<i32>} : memref<8x128xf32, #tpu.memory_space<vmem>>, vector<8x128xf32>,
    %c0_i32_8 = arith.constant 0 : i32
    %9 = arith.cmpi eq, %arg2, %c0_i32_8 : i32
    %10 = arith.extui %9 : i1 to i32
    %c0_i32_9 = arith.constant 0 : i32
    %11 = arith.cmpi ne, %10, %c0_i32_9 : i32
    scf.if %11 {
      %c0_10 = arith.constant 0 : index
      %c0_11 = arith.constant 0 : index
      %12 = vector.load %arg7[%c0_10, %c0_11] : memref<8x128xf32, #tpu.memory_space<vmem>>, vector<8x128xf32>
      %c0_12 = arith.constant 0 : index
      %c0_13 = arith.constant 0 : index
      %13 = vector.load %arg5[%c0_12, %c0_13] : memref<1x128xf32, #tpu.memory_space<vmem>>, vector<1x128xf32>
      %14 = vector.broadcast %13 : vector<1x128xf32> to vector<8x128xf32>
      %15 = arith.addf %12, %14 : vector<8x128xf32>
      %16 = arith.negf %15 : vector<8x128xf32>
      %17 = math.exp %16 : vector<8x128xf32>
      %cst_14 = arith.constant 1.000000e+00 : f32
      %18 = vector.broadcast %cst_14 : f32 to vector<8x128xf32>
      %19 = arith.addf %18, %17 : vector<8x128xf32>
      %20 = arith.divf %18, %19 : vector<8x128xf32>
      %c0_15 = arith.constant 0 : index
      %c0_16 = arith.constant 0 : index
      %21 = vector.load %arg6[%c0_15, %c0_16] : memref<8x128xf32, #tpu.memory_space<vmem>>, vector<8x128xf32>
      tpu.vector_store %arg6[%c0_15, %c0_16], %20 {strides = array<i32>} : memref<8x128xf32, #tpu.memory_space<vmem>>, vector<8x128xf32>,
    } else {
    }
    return
  }
  func.func @transform_0(%arg0: i32, %arg1: i32, %arg2: i32) -> (i32, i32) {
    %c0_i32 = arith.constant 0 : i32
    return %arg1, %arg2 : i32, i32
  }
  func.func @transform_1(%arg0: i32, %arg1: i32, %arg2: i32) -> (i32, i32) {
    %c0_i32 = arith.constant 0 : i32
    return %arg2, %arg0 : i32, i32
  }
  func.func @transform_2(%arg0: i32, %arg1: i32, %arg2: i32) -> (i32, i32) {
    %c0_i32 = arith.constant 0 : i32
    %c0_i32_0 = arith.constant 0 : i32
    return %c0_i32, %arg0 : i32, i32
  }
  func.func @transform_3(%arg0: i32, %arg1: i32, %arg2: i32) -> (i32, i32) {
    %c0_i32 = arith.constant 0 : i32
    return %arg1, %arg0 : i32, i32
  }
}

</mosaic_0001>

<bundles_post_ra>
// kernel: tpu_custom_call.1
= control target key start
LH: loop header
LB: loop body
LE: loop exit
PB: predicated region body
PF: predicated region fallthrough
CT: control target
= control target key end

     0   :  { %8 = vsyncpa [#allocation4], 0  ;;  %s263_s0 = inlined_call_operand.hbm [shape: f32[8,128], index: 0, kind: input, shape index: {}]   ;;  %s264_s1 = inlined_call_operand.hbm [shape: f32[128,128], index: 1, kind: input, shape index: {}]   ;;  %s265_s2 = inlined_call_operand.vmem [shape: f32[1,128], index: 2, kind: input, shape index: {}]   ;;  %s266_s3 = inlined_call_operand.hbm [shape: f32[8,128], index: 3, kind: output, shape index: {}]  }
   0x1   :  { %9 = vsyncpa [#allocation7], 0 }
   0x2   :  { %10 = vsyncpa [#allocation5], 0  ;;  %s16_s14 = sshll.u32 %s263_s0, 4  ;;  %s226_s15 = smov [#allocation3]   ;;  %s17_s14 = int_to_ptr.hbm [resolvable:$true] %s16_s14 }
   0x3   :  { %s18_s16 = sshll.u32 %s226_s15, 4  ;;  %s26_s19 = sshll.u32 %s264_s1, 4  ;;  %s19_s16 = int_to_ptr.vmem [resolvable:$true] %s18_s16  ;;  %s27_s19 = int_to_ptr.hbm [resolvable:$true] %s26_s19 }
   0x4   :  { %21 = dma.hbm_to_vmem [thread:$0]  %s17_s14, 128, %s19_s16, [#allocation4]  }
   0x5   :  { %s227_s20 = smov [#allocation6]   ;;  %s228_s22 = smov 128  }
   0x6   :  { %s28_s21 = sshll.u32 %s227_s20, 4  ;;  %s229_s23 = smov 8   ;;  %s29_s21 = int_to_ptr.vmem [resolvable:$true] %s28_s21 }
   0x7   :  { %34 = dma.hbm_to_vmem [thread:$0]  %s27_s19, 2048, %s29_s21, [#allocation7], %s228_s22, %s228_s22, %s229_s23  }
   0x8   :  { %220 = dma.done.wait [#allocation4], 128  }
   0x9   :  { %221 = vsyncadd [#allocation4], 4294967168 }
   0xa   :  { %222 = dma.done.wait [#allocation7], 2048  }
   0xb   :  { %223 = vsyncadd [#allocation7], 4294965248  ;;  %v67_v0 = vld [vmem:[#allocation6 + $0x78] sm:$0xff]  ;;  %v66_v1 = vld [vmem:[#allocation6 + $0x70] sm:$0xff]  ;;  %s230_s24 = smov [#allocation8]  }
   0xc   :  { %68 = vmatpush.msra.mxu0 %v67_v0  ;;  %v65_v2 = vld [vmem:[#allocation6 + $0x68] sm:$0xff]  ;;  %v64_v3 = vld [vmem:[#allocation6 + $0x60] sm:$0xff]  ;;  %v63_v4 = vld [vmem:[#allocation6 + $0x58] sm:$0xff]  ;;  %s124_s25 = sshll.u32 %s230_s24, 4  ;;  %s125_s25 = int_to_ptr.vmem [resolvable:$true] %s124_s25 }
   0xd   :  { %v62_v5 = vld [vmem:[#allocation6 + $0x50] sm:$0xff]  ;;  %v61_v6 = vld [vmem:[#allocation6 + $0x48] sm:$0xff]  ;;  %v60_v7 = vld [vmem:[#allocation6 + $0x40] sm:$0xff] }
   0xe   :  { %69 = vmatpush.msra.mxu0 %v66_v1  ;;  %v59_v8 = vld [vmem:[#allocation6 + $0x38] sm:$0xff]  ;;  %v58_v9 = vld [vmem:[#allocation6 + $0x30] sm:$0xff]  ;;  %v57_v10 = vld [vmem:[#allocation6 + $0x28] sm:$0xff] }
   0xf   :  { %v56_v11 = vld [vmem:[#allocation6 + $0x20] sm:$0xff]  ;;  %v55_v12 = vld [vmem:[#allocation6 + $0x18] sm:$0xff]  ;;  %v54_v13 = vld [vmem:[#allocation6 + $0x10] sm:$0xff] }
  0x10   :  { %70 = vmatpush.msra.mxu0 %v65_v2  ;;  %v53_v14 = vld [vmem:[#allocation6 + $0x8] sm:$0xff]  ;;  %v52_v15 = vld [vmem:[#allocation6] sm:$0xff]  ;;  %v51_v16 = vld [vmem:[#allocation3] sm:$0xff] }
  0x11   :  { %v143_v17 = vld [vmem:[%s265_s2] ss:$0 sm:$0xff]  ;;  %s126_s2 = sshll.u32 %s266_s3, 4  ;;  %s127_s2 = int_to_ptr.hbm [resolvable:$true] %s126_s2 }
  0x12   :  { %71 = vmatpush.msra.mxu0 %v64_v3 }
  0x14   :  { %72 = vmatpush.msra.mxu0 %v63_v4 }
  0x16   :  { %73 = vmatpush.msra.mxu0 %v62_v5 }
  0x18   :  { %74 = vmatpush.msra.mxu0 %v61_v6 }
  0x1a   :  { %75 = vmatpush.msra.mxu0 %v60_v7 }
  0x1c   :  { %76 = vmatpush.msra.mxu0 %v59_v8 }
  0x1e   :  { %77 = vmatpush.msra.mxu0 %v58_v9 }
  0x20   :  { %78 = vmatpush.msra.mxu0 %v57_v10 }
  0x22   :  { %79 = vmatpush.msra.mxu0 %v56_v11 }
  0x24   :  { %80 = vmatpush.msra.mxu0 %v55_v12 }
  0x26   :  { %81 = vmatpush.msra.mxu0 %v54_v13 }
  0x28   :  { %82 = vmatpush.msra.mxu0 %v53_v14 }
  0x2a   :  { %83 = vmatpush.msra.mxu0 %v52_v15 }
  0x2b   :  { %84 = vmatmul.f32.vlgmr.msra.gmra.mxu0 %v51_v16 }
  0xa8   :  { %v85_v18 = vpop.f32.mrf.mxu0 }
  0xa9   :  { %v98_v19 = vadd.f32 %v143_v17, %v85_v18 }
  0xab   :  { %v137_v20 = vmul.f32 -1.442695, %v98_v19 }
  0xad   :  { %144 = vpow2.f32 %v137_v20 }
  0xb3   :  { %v145_v21 = vpop.eup %144 }
  0xb4   :  { %v102_v22 = vadd.f32 1.0, %v145_v21 }
  0xb6   :  { %146 = vrcp.f32 %v102_v22  ;;  %v114_v26 = vand.u32 2147483648, %v102_v22  ;;  %v112_v28 = vand.u32 2147483647, %v102_v22  ;;  %vm108_vm1 = vweird.f32 %v102_v22 }
  0xb8   :  { %v115_v30 = vor.u32 1.1754944e-38, %v114_v26  ;;  %vm113_vm3 = vcmp.eq.f32.partialorder %v112_v28, 8.507059e+37 }
  0xbc   :  { %v147_v23 = vpop.eup %146 }
  0xbd   :  { %v104_v24 = vmul.f32 %v147_v23, %v102_v22  ;;  %vm109_vm0 = vweird.f32 %v147_v23 }
  0xbe   :  { %vm110_vm2 = vmor %vm108_vm1, %vm109_vm0 }
  0xbf   :  { %v105_v25 = vsub.f32 1.0, %v104_v24 }
  0xc1   :  { %v106_v27 = vmul.f32 %v147_v23, %v105_v25 }
  0xc3   :  { %v107_v29 = vadd.f32 %v147_v23, %v106_v27 }
  0xc5   :  { %v111_v31 = vsel %vm110_vm2, %v147_v23, %v107_v29 }
  0xc6   :  { %v116_v32 = vsel %vm113_vm3, %v115_v30, %v111_v31 }
  0xc7   :  { %118 = vst [vmem:[#allocation8] sm:$0xff] %v116_v32 }
  0xc8   :  { %129 = dma.vmem_to_hbm [thread:$0]  %s125_s25, 128, %s127_s2, [#allocation5]  }
  0xc9   :  { %224 = dma.done.wait [#allocation5], 128  }
  0xca   :  { %225 = vsyncadd [#allocation5], 4294967168 }
  0xcb   :  { %134 = vsyncpa [#allocation4], 1 }
  0xcc   :  { %135 = vsyncpa [#allocation7], 1 }
  0xcd   :  { %136 = vsyncpa [#allocation5], 1 }

</bundles_post_ra>
